<compile_context>
chip_gen: v6e
topology: v6e:2x2x1
jax: 0.10.0
libtpu: 0.0.40
codegen_flags: <defaults>
</compile_context>

<pallas_src>
import functools

import jax
import jax.numpy as jnp
from jax.experimental import pallas as pl
from jax.experimental.pallas import tpu as pltpu

IMG = 28
KSZ = 3
OUT_HW = IMG - KSZ + 1            # 26
FLAT_CONV = OUT_HW * OUT_HW       # 676  (conv output length, pre-fold)
FLAT_IN = IMG * IMG               # 784  (raw pixels streamed to the kernel)
FLAT_IN_P = 896                   # 784 padded up to 7*128 (lane-dense MXU K)
HID = 100
NCLS = 10
HID_P = 128                       # hidden padded to 128
CLS_P = 128                       # classes padded to 128 (unmasked vst)
BATCH_ALIGN = 16                  # bf16 minimum sublane tile


def _digit_conv_kernel(x_ref, w1_ref, b1_ref, w2_ref, b2_ref, o_ref):
    # x_ref:  (TB, 896) bf16 raw flattened images (zero-padded lanes/rows).
    # w1_ref: (896, 128) bf16 conv-folded first-layer weights (VMEM-resident).
    # Layer 1: conv + linear1 fused into one MXU matmul, f32 accumulation.
    h1 = jnp.dot(x_ref[...], w1_ref[...], preferred_element_type=jnp.float32)
    h1 = jnp.maximum(h1 + b1_ref[...], 0.0)
    # Layer 2: (TB,128)@(128,128) in f32; zero-padded lanes stay zero.
    out = jnp.dot(h1, w2_ref[...], preferred_element_type=jnp.float32) + b2_ref[...]
    o_ref[...] = out.astype(o_ref.dtype)      # lane-dense (TB, 128) store


def _round_up(n, m):
    return ((n + m - 1) // m) * m


@functools.partial(jax.jit, static_argnames=("tb_max",))
def digit_conv_model_forward(x, w_conv, w1, b1, w2, b2, *, tb_max=512):
    """
    x:      (B, 784) f32 flattened 28x28 images (as passed to forward()).
    w_conv: (3, 3)   f32 convolution weights.
    w1:     (676, 100) = linear1.weight.T ; b1: (100,)
    w2:     (100, 10)  = linear2.weight.T ; b2: (10,)
    returns logits (B, 10).
    """
    B = x.shape[0]
    xf = x.reshape(B, FLAT_IN).astype(jnp.float32)

    # ---- fold the 3x3 'valid' conv into an effective (784,100) weight (f32) ----
    w1_img = w1.astype(jnp.float32).reshape(OUT_HW, OUT_HW, HID)
    w1_eff = jnp.zeros((IMG, IMG, HID), jnp.float32)
    for i in range(KSZ):
        for j in range(KSZ):
            w1_eff = w1_eff.at[i:i + OUT_HW, j:j + OUT_HW, :].add(
                w_conv[i, j].astype(jnp.float32) * w1_img)
    w1_eff = w1_eff.reshape(FLAT_IN, HID)

    # zero-pad to lane-dense tiles (inert through relu and both matmuls);
    # cast the streamed-weight and activation tensors to bf16, keep biases /
    # second-layer weights in f32 (tiny, VMEM-resident, f32 accumulation).
    w1p = jnp.pad(w1_eff, ((0, FLAT_IN_P - FLAT_IN),
                           (0, HID_P - HID))).astype(jnp.bfloat16)
    b1p = jnp.pad(b1.astype(jnp.float32).reshape(1, HID),
                  ((0, 0), (0, HID_P - HID)))
    w2p = jnp.pad(w2.astype(jnp.float32),
                  ((0, HID_P - HID), (0, CLS_P - NCLS)))
    b2p = jnp.pad(b2.astype(jnp.float32).reshape(1, NCLS),
                  ((0, 0), (0, CLS_P - NCLS)))

    # ---- batch tiling: even split, <= one sublane group of padding ----
    n_tiles = max(1, -(-B // tb_max))
    if B >= 512:
        n_tiles = max(n_tiles, 2)   # >=2 grid steps so both v7x TCs get work
    tb = min(_round_up(-(-B // n_tiles), BATCH_ALIGN),
             _round_up(tb_max, BATCH_ALIGN))
    bp = _round_up(B, tb)

    xp = jnp.pad(xf, ((0, bp - B), (0, FLAT_IN_P - FLAT_IN))).astype(jnp.bfloat16)

    flops = 2 * bp * (FLAT_IN_P * HID_P + HID_P * CLS_P)
    bytes_accessed = (xp.size * 2 + w1p.size * 2
                      + (b1p.size + w2p.size + b2p.size) * 4
                      + bp * CLS_P * 4)
    cost = pl.CostEstimate(flops=flops, transcendentals=0,
                           bytes_accessed=bytes_accessed)

    out = pl.pallas_call(
        _digit_conv_kernel,
        out_shape=jax.ShapeDtypeStruct((bp, CLS_P), jnp.float32),
        grid=(bp // tb,),
        in_specs=[
            pl.BlockSpec((tb, FLAT_IN_P), lambda i: (i, 0)),     # x batch tile
            pl.BlockSpec((FLAT_IN_P, HID_P), lambda i: (0, 0)),  # w1_eff (resident)
            pl.BlockSpec((1, HID_P), lambda i: (0, 0)),          # b1
            pl.BlockSpec((HID_P, CLS_P), lambda i: (0, 0)),      # w2
            pl.BlockSpec((1, CLS_P), lambda i: (0, 0)),          # b2
        ],
        out_specs=pl.BlockSpec((tb, CLS_P), lambda i: (i, 0)),
        compiler_params=pltpu.CompilerParams(
            dimension_semantics=("parallel",),                   # shard batch tiles
            vmem_limit_bytes=32 * 1024 * 1024),
        cost_estimate=cost,
    )(xp, w1p, b1p, w2p, b2p)

    # drop batch padding and the 118 zero-padded class lanes.
    return out[:B, :NCLS]


def _reference_forward(x, w_conv, w1, b1, w2, b2):
    B = x.shape[0]
    imgs = x.reshape(B, IMG, IMG)
    conv = jnp.zeros((B, OUT_HW, OUT_HW), jnp.float32)
    for i in range(KSZ):
        for j in range(KSZ):
            conv = conv + w_conv[i, j] * imgs[:, i:i + OUT_HW, j:j + OUT_HW]
    flat = conv.reshape(B, FLAT_CONV)
    h1 = jnp.maximum(flat @ w1 + b1, 0.0)
    return h1 @ w2 + b2


if __name__ == "__main__":
    key = jax.random.PRNGKey(0)
    kx, kc, k1, k2, k3, k4 = jax.random.split(key, 6)
    batch = 8  # matches the module's DataLoader batch_size

    x = jax.random.uniform(kx, (batch, IMG * IMG), jnp.float32)      # MNIST-like pixels
    w_conv = jax.random.normal(kc, (KSZ, KSZ), jnp.float32) * 0.5
    w1 = jax.random.normal(k1, (FLAT_CONV, HID), jnp.float32) * 0.05  # linear1.weight.T
    b1 = jax.random.normal(k2, (HID,), jnp.float32) * 0.1
    w2 = jax.random.normal(k3, (HID, NCLS), jnp.float32) * 0.1        # linear2.weight.T
    b2 = jax.random.normal(k4, (NCLS,), jnp.float32) * 0.1

    out = digit_conv_model_forward(x, w_conv, w1, b1, w2, b2)
    out = jax.block_until_ready(out)

    ref = _reference_forward(x, w_conv, w1, b1, w2, b2)
    assert out.shape == (batch, NCLS)
    # bf16 activation/weight stream (f32 accumulation) -> loose-but-meaningful tol.
    assert jnp.allclose(out, ref, atol=5e-2, rtol=5e-2), \
        float(jnp.max(jnp.abs(out - ref)))
    print("KERNEL_OK")
</pallas_src>

<mosaic_0001>
module attributes {stable_mosaic.version = 11 : i64} {
  func.func @_digit_conv_kernel(%arg0: i32, %arg1: memref<16x896xbf16, #tpu.memory_space<vmem>>, %arg2: memref<896x128xbf16, #tpu.memory_space<vmem>>, %arg3: memref<1x128xf32, #tpu.memory_space<vmem>>, %arg4: memref<128x128xf32, #tpu.memory_space<vmem>>, %arg5: memref<1x128xf32, #tpu.memory_space<vmem>>, %arg6: memref<16x128xf32, #tpu.memory_space<vmem>>) attributes {dimension_semantics = [#tpu.dimension_semantics<parallel>], iteration_bounds = array<i64: 1>, scalar_prefetch = 0 : i64, scratch_operands = 0 : i64, tpu.core_type = #tpu.core_type<tc>, window_params = [{transform_indices = @transform_0, window_bounds = array<i64: 16, 896>}, {pipeline_mode = #tpu.pipeline_mode<synchronous>, transform_indices = @transform_1, window_bounds = array<i64: 896, 128>}, {pipeline_mode = #tpu.pipeline_mode<synchronous>, transform_indices = @transform_2, window_bounds = array<i64: 1, 128>}, {pipeline_mode = #tpu.pipeline_mode<synchronous>, transform_indices = @transform_3, window_bounds = array<i64: 128, 128>}, {pipeline_mode = #tpu.pipeline_mode<synchronous>, transform_indices = @transform_4, window_bounds = array<i64: 1, 128>}, {transform_indices = @transform_5, window_bounds = array<i64: 16, 128>}]} {
    %c0 = arith.constant 0 : index
    %c0_0 = arith.constant 0 : index
    %0 = vector.load %arg1[%c0, %c0_0] : memref<16x896xbf16, #tpu.memory_space<vmem>>, vector<16x896xbf16>
    %c0_1 = arith.constant 0 : index
    %c0_2 = arith.constant 0 : index
    %1 = vector.load %arg2[%c0_1, %c0_2] : memref<896x128xbf16, #tpu.memory_space<vmem>>, vector<896x128xbf16>
    %cst = arith.constant dense<0.000000e+00> : vector<16x128xf32>
    %2 = tpu.matmul %0, %1, %cst {dimension_numbers = #tpu.dot_dimension_numbers<[1], [0], [0], [1], [0, 0, 1, 1], [], []>} : vector<16x896xbf16>, vector<896x128xbf16>, vector<16x128xf32> -> vector<16x128xf32>
    %c0_3 = arith.constant 0 : index
    %c0_4 = arith.constant 0 : index
    %3 = vector.load %arg3[%c0_3, %c0_4] : memref<1x128xf32, #tpu.memory_space<vmem>>, vector<1x128xf32>
    %4 = vector.broadcast %3 : vector<1x128xf32> to vector<16x128xf32>
    %5 = arith.addf %2, %4 : vector<16x128xf32>
    %cst_5 = arith.constant 0.000000e+00 : f32
    %6 = vector.broadcast %cst_5 : f32 to vector<16x128xf32>
    %7 = arith.maximumf %5, %6 : vector<16x128xf32>
    %c0_6 = arith.constant 0 : index
    %c0_7 = arith.constant 0 : index
    %8 = vector.load %arg4[%c0_6, %c0_7] : memref<128x128xf32, #tpu.memory_space<vmem>>, vector<128x128xf32>
    %cst_8 = arith.constant dense<0.000000e+00> : vector<16x128xf32>
    %9 = tpu.matmul %7, %8, %cst_8 {dimension_numbers = #tpu.dot_dimension_numbers<[1], [0], [0], [1], [0, 0, 1, 1], [], []>} : vector<16x128xf32>, vector<128x128xf32>, vector<16x128xf32> -> vector<16x128xf32>
    %c0_9 = arith.constant 0 : index
    %c0_10 = arith.constant 0 : index
    %10 = vector.load %arg5[%c0_9, %c0_10] : memref<1x128xf32, #tpu.memory_space<vmem>>, vector<1x128xf32>
    %11 = vector.broadcast %10 : vector<1x128xf32> to vector<16x128xf32>
    %12 = arith.addf %9, %11 : vector<16x128xf32>
    %c0_11 = arith.constant 0 : index
    %c0_12 = arith.constant 0 : index
    %13 = vector.load %arg6[%c0_11, %c0_12] : memref<16x128xf32, #tpu.memory_space<vmem>>, vector<16x128xf32>
    tpu.vector_store %arg6[%c0_11, %c0_12], %12 {strides = array<i32>} : memref<16x128xf32, #tpu.memory_space<vmem>>, vector<16x128xf32>,
    return
  }
  func.func @transform_0(%arg0: i32) -> (i32, i32) {
    %c0_i32 = arith.constant 0 : i32
    %c0_i32_0 = arith.constant 0 : i32
    return %arg0, %c0_i32 : i32, i32
  }
  func.func @transform_1(%arg0: i32) -> (i32, i32) {
    %c0_i32 = arith.constant 0 : i32
    %c0_i32_0 = arith.constant 0 : i32
    %c0_i32_1 = arith.constant 0 : i32
    return %c0_i32, %c0_i32_0 : i32, i32
  }
  func.func @transform_2(%arg0: i32) -> (i32, i32) {
    %c0_i32 = arith.constant 0 : i32
    %c0_i32_0 = arith.constant 0 : i32
    %c0_i32_1 = arith.constant 0 : i32
    return %c0_i32, %c0_i32_0 : i32, i32
  }
  func.func @transform_3(%arg0: i32) -> (i32, i32) {
    %c0_i32 = arith.constant 0 : i32
    %c0_i32_0 = arith.constant 0 : i32
    %c0_i32_1 = arith.constant 0 : i32
    return %c0_i32, %c0_i32_0 : i32, i32
  }
  func.func @transform_4(%arg0: i32) -> (i32, i32) {
    %c0_i32 = arith.constant 0 : i32
    %c0_i32_0 = arith.constant 0 : i32
    %c0_i32_1 = arith.constant 0 : i32
    return %c0_i32, %c0_i32_0 : i32, i32
  }
  func.func @transform_5(%arg0: i32) -> (i32, i32) {
    %c0_i32 = arith.constant 0 : i32
    %c0_i32_0 = arith.constant 0 : i32
    return %arg0, %c0_i32 : i32, i32
  }
}

</mosaic_0001>

<bundles_post_ra>
// kernel: digit_conv_model_forward.1
= control target key start
LH: loop header
LB: loop body
LE: loop exit
PB: predicated region body
PF: predicated region fallthrough
CT: control target
= control target key end

     0   :  { %v1071_v36 = vmov 0.0   ;;  %vm1072_vm0 = vmmov 0   ;;  %s1352_s1 = inlined_call_operand.vmem [shape: bf16[896,128], index: 1, kind: input, shape index: {}]   ;;  %s1353_s0 = inlined_call_operand.vmem [shape: bf16[16,896], index: 0, kind: input, shape index: {}]   ;;  %s1354_s3 = inlined_call_operand.vmem [shape: f32[128,128], index: 3, kind: input, shape index: {}]   ;;  %s1355_s2 = inlined_call_operand.vmem [shape: f32[1,128], index: 2, kind: input, shape index: {}]   ;;  %s1356_s4 = inlined_call_operand.vmem [shape: f32[1,128], index: 4, kind: input, shape index: {}]   ;;  %s1357_s5 = inlined_call_operand.vmem [shape: f32[16,128], index: 5, kind: output, shape index: {}]  }
   0x1   :  { %v1005_v0 = vld [vmem:[%s1352_s1 + $0x78] sm:$0xff]   ;;  %v1009_v4 = vld [vmem:[%s1352_s1 + $0x70] sm:$0xff]   ;;  %v1013_v8 = vld [vmem:[%s1352_s1 + $0x68] sm:$0xff]  }
   0x2   :  { %v1006_v1 = vld [vmem:[%s1352_s1 + $0xf8] sm:$0xff]   ;;  %855 = vmatprep.subr.bf16.mxu0 %v1005_v0  ;;  %v1010_v5 = vld [vmem:[%s1352_s1 + $0xf0] sm:$0xff]   ;;  %v1014_v9 = vld [vmem:[%s1352_s1 + $0xe8] sm:$0xff]  }
   0x3   :  { %v1007_v2 = vld [vmem:[%s1352_s1 + $0x38] sm:$0xff]   ;;  %877 = vmatprep.subr.bf16.mxu1 %v1006_v1  ;;  %v1011_v6 = vld [vmem:[%s1352_s1 + $0x30] sm:$0xff]   ;;  %v1015_v10 = vld [vmem:[%s1352_s1 + $0x28] sm:$0xff]  }
   0x4   :  { %v1008_v3 = vld [vmem:[%s1352_s1 + $0xb8] sm:$0xff]   ;;  %856 = vmatpush3.bf16.msra.mxu0 %v1007_v2  ;;  %v1012_v7 = vld [vmem:[%s1352_s1 + $0xb0] sm:$0xff]   ;;  %v1016_v11 = vld [vmem:[%s1352_s1 + $0xa8] sm:$0xff]  }
   0x5   :  { %878 = vmatpush3.bf16.msra.mxu1 %v1008_v3  ;;  %857 = vmatprep.subr.bf16.mxu0 %v1009_v4  ;;  %v1017_v12 = vld [vmem:[%s1352_s1 + $0x60] sm:$0xff]   ;;  %v1021_v16 = vld [vmem:[%s1352_s1 + $0x58] sm:$0xff]   ;;  %v1025_v20 = vld [vmem:[%s1352_s1 + $0x50] sm:$0xff]  }
   0x6   :  { %879 = vmatprep.subr.bf16.mxu1 %v1010_v5  ;;  %v1018_v13 = vld [vmem:[%s1352_s1 + $0xe0] sm:$0xff]   ;;  %v1022_v17 = vld [vmem:[%s1352_s1 + $0xd8] sm:$0xff]   ;;  %v1026_v21 = vld [vmem:[%s1352_s1 + $0xd0] sm:$0xff]  }
   0x7   :  { %v1019_v14 = vld [vmem:[%s1352_s1 + $0x20] sm:$0xff]   ;;  %v1023_v18 = vld [vmem:[%s1352_s1 + $0x18] sm:$0xff]   ;;  %v1027_v22 = vld [vmem:[%s1352_s1 + $0x10] sm:$0xff]  }
   0x8   :  { %858 = vmatpush3.bf16.msra.mxu0 %v1011_v6  ;;  %v1020_v15 = vld [vmem:[%s1352_s1 + $0xa0] sm:$0xff]   ;;  %v1024_v19 = vld [vmem:[%s1352_s1 + $0x98] sm:$0xff]   ;;  %v1028_v23 = vld [vmem:[%s1352_s1 + $0x90] sm:$0xff]  }
   0x9   :  { %880 = vmatpush3.bf16.msra.mxu1 %v1012_v7  ;;  %859 = vmatprep.subr.bf16.mxu0 %v1013_v8  ;;  %v1029_v24 = vld [vmem:[%s1352_s1 + $0x48] sm:$0xff]   ;;  %v1033_v28 = vld [vmem:[%s1352_s1 + $0x40] sm:$0xff]   ;;  %v1043_v37 = vld [vmem:[%s1352_s1 + $0x178] sm:$0xff]  }
   0xa   :  { %881 = vmatprep.subr.bf16.mxu1 %v1014_v9  ;;  %v1030_v25 = vld [vmem:[%s1352_s1 + $0xc8] sm:$0xff]   ;;  %v1034_v29 = vld [vmem:[%s1352_s1 + $0xc0] sm:$0xff]   ;;  %v1044_v38 = vld [vmem:[%s1352_s1 + $0x138] sm:$0xff]  }
   0xb   :  { %v1031_v26 = vld [vmem:[%s1352_s1 + $0x8] sm:$0xff]   ;;  %v1035_v30 = vld [vmem:[%s1352_s1] sm:$0xff]   ;;  %v1045_v39 = vld [vmem:[%s1352_s1 + $0x1b8] sm:$0xff]  }
   0xc   :  { %860 = vmatpush3.bf16.msra.mxu0 %v1015_v10  ;;  %v1032_v27 = vld [vmem:[%s1352_s1 + $0x88] sm:$0xff]   ;;  %v1036_v31 = vld [vmem:[%s1352_s1 + $0x80] sm:$0xff]   ;;  %v1046_v40 = vld [vmem:[%s1352_s1 + $0x170] sm:$0xff]  }
   0xd   :  { %882 = vmatpush3.bf16.msra.mxu1 %v1016_v11  ;;  %861 = vmatprep.subr.bf16.mxu0 %v1017_v12  ;;  %v1037_v32 = vld [vmem:[%s1353_s0] ss:$28 sps:$4 sm:$0xff]   ;;  %v1040_v34 = vld [vmem:[%s1353_s0 + $0x8] ss:$28 sps:$4 sm:$0xff]   ;;  %v1047_v41 = vld [vmem:[%s1352_s1 + $0x130] sm:$0xff]  }
   0xe   :  { %883 = vmatprep.subr.bf16.mxu1 %v1018_v13  ;;  %v1039_v33 = vld [vmem:[%s1353_s0 + $0x4] ss:$28 sps:$4 sm:$0xff]   ;;  %v1042_v35 = vld [vmem:[%s1353_s0 + $0xc] ss:$28 sps:$4 sm:$0xff]   ;;  %v1048_v42 = vld [vmem:[%s1352_s1 + $0x1b0] sm:$0xff]  }
   0xf   :  { %552 = vmatprep.mubr.bf16.mxu0 %v1039_v33  ;;  %593 = vmatprep.mubr.bf16.mxu1 %v1042_v35  ;;  %v1049_v43 = vld [vmem:[%s1352_s1 + $0x168] sm:$0xff]   ;;  %v1052_v46 = vld [vmem:[%s1352_s1 + $0x160] sm:$0xff]   ;;  %v1055_v49 = vld [vmem:[%s1352_s1 + $0x158] sm:$0xff]  }
  0x10   :  { %862 = vmatpush3.bf16.msra.mxu0 %v1019_v14  ;;  %v1050_v44 = vld [vmem:[%s1352_s1 + $0x128] sm:$0xff]   ;;  %v1053_v47 = vld [vmem:[%s1352_s1 + $0x120] sm:$0xff]   ;;  %v1056_v50 = vld [vmem:[%s1352_s1 + $0x118] sm:$0xff]  }
  0x11   :  { %884 = vmatpush3.bf16.msra.mxu1 %v1020_v15  ;;  %863 = vmatprep.subr.bf16.mxu0 %v1021_v16  ;;  %v1051_v45 = vld [vmem:[%s1352_s1 + $0x1a8] sm:$0xff]   ;;  %v1054_v48 = vld [vmem:[%s1352_s1 + $0x1a0] sm:$0xff]   ;;  %v1057_v51 = vld [vmem:[%s1352_s1 + $0x198] sm:$0xff]  }
  0x12   :  { %885 = vmatprep.subr.bf16.mxu1 %v1022_v17  ;;  %v1058_v52 = vld [vmem:[%s1352_s1 + $0x150] sm:$0xff]   ;;  %v1061_v55 = vld [vmem:[%s1352_s1 + $0x148] sm:$0xff]   ;;  %v1064_v58 = vld [vmem:[%s1352_s1 + $0x140] sm:$0xff]  }
  0x13   :  { %v1059_v53 = vld [vmem:[%s1352_s1 + $0x110] sm:$0xff]   ;;  %v1062_v56 = vld [vmem:[%s1352_s1 + $0x108] sm:$0xff]   ;;  %v1065_v60 = vld [vmem:[%s1352_s1 + $0x100] sm:$0xff]  }
  0x14   :  { %864 = vmatpush3.bf16.msra.mxu0 %v1023_v18  ;;  %v1060_v54 = vld [vmem:[%s1352_s1 + $0x190] sm:$0xff]   ;;  %v1063_v57 = vld [vmem:[%s1352_s1 + $0x188] sm:$0xff]   ;;  %v1066_v61 = vld [vmem:[%s1352_s1 + $0x180] sm:$0xff]  }
  0x15   :  { %886 = vmatpush3.bf16.msra.mxu1 %v1024_v19  ;;  %865 = vmatprep.subr.bf16.mxu0 %v1025_v20  ;;  %v1069_v59 = vld [vmem:[%s1353_s0 + $0x14] ss:$28 sps:$4 sm:$0xff]   ;;  %v701_v0 = vld [vmem:[%s1354_s3 + $0x78] sm:$0xff]  ;;  %v699_v2 = vld [vmem:[%s1354_s3 + $0x68] sm:$0xff] }
  0x16   :  { %887 = vmatprep.subr.bf16.mxu1 %v1026_v21  ;;  %v1067_v62 = vld [vmem:[%s1353_s0 + $0x10] ss:$28 sps:$4 sm:$0xff]   ;;  %v1070_v63 = vld [vmem:[%s1353_s0 + $0x18] ss:$28 sps:$4 sm:$0xff]   ;;  %v698_v3 = vld [vmem:[%s1354_s3 + $0x60] sm:$0xff] }
  0x17   :  { %v700_v1 = vld [vmem:[%s1354_s3 + $0x70] sm:$0xff]  ;;  %v697_v4 = vld [vmem:[%s1354_s3 + $0x58] sm:$0xff]  ;;  %v695_v6 = vld [vmem:[%s1354_s3 + $0x48] sm:$0xff] }
  0x18   :  { %866 = vmatpush3.bf16.msra.mxu0 %v1027_v22  ;;  %v696_v5 = vld [vmem:[%s1354_s3 + $0x50] sm:$0xff]  ;;  %v694_v7 = vld [vmem:[%s1354_s3 + $0x40] sm:$0xff]  ;;  %v693_v8 = vld [vmem:[%s1354_s3 + $0x38] sm:$0xff] }
  0x19   :  { %888 = vmatpush3.bf16.msra.mxu1 %v1028_v23  ;;  %867 = vmatprep.subr.bf16.mxu0 %v1029_v24  ;;  %v692_v9 = vld [vmem:[%s1354_s3 + $0x30] sm:$0xff]  ;;  %v691_v10 = vld [vmem:[%s1354_s3 + $0x28] sm:$0xff]  ;;  %v690_v11 = vld [vmem:[%s1354_s3 + $0x20] sm:$0xff] }
  0x1a   :  { %889 = vmatprep.subr.bf16.mxu1 %v1030_v25  ;;  %v689_v12 = vld [vmem:[%s1354_s3 + $0x18] sm:$0xff]  ;;  %v688_v13 = vld [vmem:[%s1354_s3 + $0x10] sm:$0xff]  ;;  %v687_v14 = vld [vmem:[%s1354_s3 + $0x8] sm:$0xff] }
  0x1b   :  { %v686_v15 = vld [vmem:[%s1354_s3] sm:$0xff] }
  0x1c   :  { %868 = vmatpush3.bf16.msra.mxu0 %v1031_v26  ;;  %v790_v23 = vld [vmem:[%s1355_s2] ss:$0 sm:$0xff] }
  0x1d   :  { %890 = vmatpush3.bf16.msra.mxu1 %v1032_v27  ;;  %869 = vmatprep.subr.bf16.mxu0 %v1033_v28 }
  0x1e   :  { %891 = vmatprep.subr.bf16.mxu1 %v1034_v29 }
  0x20   :  { %870 = vmatpush3.bf16.msra.mxu0 %v1035_v30 }
  0x21   :  { %892 = vmatpush3.bf16.msra.mxu1 %v1036_v31  ;;  %899 = vmatprep.subr.bf16.mxu0 %v1043_v37 }
  0x22   :  { %948 = vmatprep.subr.bf16.mxu1 %v1071_v36 }
  0x23   :  { %553 = vmatmul.mubr.bf16.vlgmr.msra.gmra.mxu0 %v1037_v32 }
  0x24   :  { %594 = vmatmul.mubr.bf16.vlgmr.msra.gmra.mxu1 %v1040_v34  ;;  %900 = vmatpush3.bf16.msra.mxu0 %v1044_v38 }
  0x25   :  { %964 = vmatprep.mubr.msk.bf16.mxu1 %vm1072_vm0, %v1071_v36  ;;  %949 = vmatpush3.bf16.msra.mxu1 %v1045_v39 }
  0x26   :  { %901 = vmatprep.subr.bf16.mxu0 %v1046_v40  ;;  %950 = vmatprep.subr.bf16.mxu1 %v1071_v36 }
  0x27   :  { %634 = vmatprep.mubr.bf16.mxu0 %v1069_v59 }
  0x28   :  { %902 = vmatpush3.bf16.msra.mxu0 %v1047_v41 }
  0x29   :  { %951 = vmatpush3.bf16.msra.mxu1 %v1048_v42  ;;  %903 = vmatprep.subr.bf16.mxu0 %v1049_v43 }
  0x2a   :  { %952 = vmatprep.subr.bf16.mxu1 %v1071_v36 }
  0x2c   :  { %904 = vmatpush3.bf16.msra.mxu0 %v1050_v44 }
  0x2d   :  { %953 = vmatpush3.bf16.msra.mxu1 %v1051_v45  ;;  %905 = vmatprep.subr.bf16.mxu0 %v1052_v46 }
  0x2e   :  { %954 = vmatprep.subr.bf16.mxu1 %v1071_v36 }
  0x30   :  { %906 = vmatpush3.bf16.msra.mxu0 %v1053_v47 }
  0x31   :  { %955 = vmatpush3.bf16.msra.mxu1 %v1054_v48  ;;  %907 = vmatprep.subr.bf16.mxu0 %v1055_v49  ;;  %v854_v49 = vld [vmem:[%s1356_s4] ss:$0 sm:$0xff] }
  0x32   :  { %956 = vmatprep.subr.bf16.mxu1 %v1071_v36 }
  0x34   :  { %908 = vmatpush3.bf16.msra.mxu0 %v1056_v50 }
  0x35   :  { %957 = vmatpush3.bf16.msra.mxu1 %v1057_v51  ;;  %909 = vmatprep.subr.bf16.mxu0 %v1058_v52 }
  0x36   :  { %958 = vmatprep.subr.bf16.mxu1 %v1071_v36 }
  0x38   :  { %910 = vmatpush3.bf16.msra.mxu0 %v1059_v53 }
  0x39   :  { %959 = vmatpush3.bf16.msra.mxu1 %v1060_v54  ;;  %911 = vmatprep.subr.bf16.mxu0 %v1061_v55 }
  0x3a   :  { %960 = vmatprep.subr.bf16.mxu1 %v1071_v36 }
  0x3c   :  { %912 = vmatpush3.bf16.msra.mxu0 %v1062_v56 }
  0x3d   :  { %961 = vmatpush3.bf16.msra.mxu1 %v1063_v57  ;;  %913 = vmatprep.subr.bf16.mxu0 %v1064_v58 }
  0x3e   :  { %962 = vmatprep.subr.bf16.mxu1 %v1071_v36 }
  0x40   :  { %914 = vmatpush3.bf16.msra.mxu0 %v1065_v60 }
  0x41   :  { %963 = vmatpush3.bf16.msra.mxu1 %v1066_v61  ;;  %968 = vmatprep.subr.mxu0 %v701_v0 }
  0x43   :  { %635 = vmatmul.mubr.bf16.vlgmr.msra.gmra.mxu0 %v1067_v62 }
  0x44   :  { %965 = vmatmul.mubr.bf16.vlgmr.msra.gmra.mxu1 %v1070_v63  ;;  %969 = vmatpush3.msra.mxu0 %v701_v0 }
  0x45   :  { %970 = vmatprep.subr.mxu0 %v700_v1 }
  0x46   :  { %971 = vmatpush3.msra.mxu0 %v700_v1 }
  0x47   :  { %972 = vmatprep.subr.mxu0 %v699_v2 }
  0x48   :  { %973 = vmatpush3.msra.mxu0 %v699_v2 }
  0x49   :  { %974 = vmatprep.subr.mxu0 %v698_v3 }
  0x4a   :  { %975 = vmatpush3.msra.mxu0 %v698_v3 }
  0x4b   :  { %976 = vmatprep.subr.mxu0 %v697_v4 }
  0x4c   :  { %977 = vmatpush3.msra.mxu0 %v697_v4 }
  0x4d   :  { %978 = vmatprep.subr.mxu0 %v696_v5 }
  0x4e   :  { %979 = vmatpush3.msra.mxu0 %v696_v5 }
  0x4f   :  { %980 = vmatprep.subr.mxu0 %v695_v6 }
  0x50   :  { %981 = vmatpush3.msra.mxu0 %v695_v6 }
  0x51   :  { %982 = vmatprep.subr.mxu0 %v694_v7 }
  0x52   :  { %983 = vmatpush3.msra.mxu0 %v694_v7 }
  0x53   :  { %984 = vmatprep.subr.mxu0 %v693_v8 }
  0x54   :  { %985 = vmatpush3.msra.mxu0 %v693_v8 }
  0x55   :  { %986 = vmatprep.subr.mxu0 %v692_v9 }
  0x56   :  { %987 = vmatpush3.msra.mxu0 %v692_v9 }
  0x57   :  { %988 = vmatprep.subr.mxu0 %v691_v10 }
  0x58   :  { %989 = vmatpush3.msra.mxu0 %v691_v10 }
  0x59   :  { %990 = vmatprep.subr.mxu0 %v690_v11 }
  0x5a   :  { %991 = vmatpush3.msra.mxu0 %v690_v11 }
  0x5b   :  { %992 = vmatprep.subr.mxu0 %v689_v12 }
  0x5c   :  { %993 = vmatpush3.msra.mxu0 %v689_v12 }
  0x5d   :  { %994 = vmatprep.subr.mxu0 %v688_v13 }
  0x5e   :  { %995 = vmatpush3.msra.mxu0 %v688_v13 }
  0x5f   :  { %996 = vmatprep.subr.mxu0 %v687_v14 }
  0x60   :  { %997 = vmatpush3.msra.mxu0 %v687_v14 }
  0x61   :  { %998 = vmatprep.subr.mxu0 %v686_v15 }
  0x62   :  { %999 = vmatpush3.msra.mxu0 %v686_v15 }
  0xe3   :  { %v871_v16 = vpop.f32.mrf.mxu0 }
  0xe4   :  { %v893_v17 = vpop.f32.mrf.mxu1 }
  0xe5   :  { %v872_v18 = vpop.f32.mrf.mxu0 }
  0xe6   :  { %v894_v19 = vpop.f32.mrf.mxu1  ;;  %v873_v21 = vadd.f32 %v872_v18, %v871_v16 }
  0xe7   :  { %v874_v20 = vpop.f32.mrf.mxu0  ;;  %v895_v26 = vadd.f32 %v894_v19, %v893_v17 }
  0xe8   :  { %v896_v22 = vpop.f32.mrf.mxu1  ;;  %v555_v25 = vadd.f32 %v873_v21, %v790_v23 }
  0xe9   :  { %v875_v24 = vpop.f32.mrf.mxu0 }
  0xea   :  { %v876_v27 = vadd.f32 %v875_v24, %v874_v20  ;;  %v897_v28 = vpop.f32.mrf.mxu1  ;;  %v596_v32 = vadd.f32 %v895_v26, %v555_v25 }
  0xeb   :  { %v898_v34 = vadd.f32 %v897_v28, %v896_v22 }
  0xec   :  { %v558_v33 = vadd.f32 %v876_v27, %v790_v23 }
  0xee   :  { %v599_v41 = vadd.f32 %v898_v34, %v558_v33 }
 0x103   :  { %v915_v29 = vpop.f32.mrf.mxu0 }
 0x104   :  { %v677_v30 = vpop.f32.mrf.mxu1 }
 0x105   :  { %v916_v31 = vpop.f32.mrf.mxu0 }
 0x106   :  { %v917_v35 = vadd.f32 %v916_v31, %v915_v29  ;;  %v966_v36 = vpop.f32.mrf.mxu1 }
 0x107   :  { %v918_v37 = vpop.f32.mrf.mxu0 }
 0x108   :  { %v637_v38 = vadd.f32 %v917_v35, %v596_v32  ;;  %v680_v39 = vpop.f32.mrf.mxu1 }
 0x109   :  { %v919_v40 = vpop.f32.mrf.mxu0 }
 0x10a   :  { %v920_v42 = vadd.f32 %v919_v40, %v918_v37  ;;  %v967_v43 = vpop.f32.mrf.mxu1  ;;  %v678_v44 = vadd.f32 %v677_v30, %v637_v38 }
 0x10c   :  { %v640_v45 = vadd.f32 %v920_v42, %v599_v41  ;;  %v684_v46 = vmax.f32 %v678_v44, 0.0 }
 0x10e   :  { %v681_v47 = vadd.f32 %v680_v39, %v640_v45  ;;  %1000 = vmatprep.mubr.f32.mxu0 %v684_v46 }
 0x110   :  { %v685_v48 = vmax.f32 %v681_v47, 0.0 }
 0x112   :  { %1001 = vmatmul.mubr.f32.vlgmr.msra.gmra.mxu0 %v685_v48 }
 0x1d2   :  { %v1002_v50 = vpop.f32.mrf.mxu0 }
 0x1d3   :  { %v781_v51 = vadd.f32 %v1002_v50, %v854_v49 }
 0x1d4   :  { %v775_v52 = vpop.f32.mrf.mxu0 }
 0x1d5   :  { %785 = vst [vmem:[%s1357_s5 + $0x8] sm:$0xff] %v781_v51  ;;  %v776_v53 = vadd.f32 %v854_v49, %v775_v52 }
 0x1d7   :  { %784 = vst [vmem:[%s1357_s5] sm:$0xff] %v776_v53 }

</bundles_post_ra>
